<compile_context>
chip_gen: v5e
topology: v5e:2x2
jax: 0.10.0
libtpu: 0.0.40
codegen_flags: <defaults>
</compile_context>

<pallas_src>
import jax
import jax.numpy as jnp
from jax.experimental import pallas as pl
from jax.experimental.pallas import tpu as pltpu

# ----------------------------- configuration -------------------------------
N, H, W, C = 2, 16, 16, 3         # batch, height, width, channels (RGB)
HW = H * W                        # 256 "anchor" boxes (one per pixel), lane-dense
NC = 3                            # number of classes
NO = NC + 5                       # per-box prediction size (xywh, obj, cls...)
CONF_THRES = 0.25                 # autoShape.conf
IOU_THRES = 0.45                  # autoShape.iou
MAX_WH = 4096.0                   # class-offset for class-aware NMS
MAX_DET = 300                     # reference max detections per image
KEEP = min(MAX_DET, HW)           # 256: at most HW boxes can ever be kept
STRIP = 32                        # IoU row-strip height (bounds live vregs)


# ------------------------------ fused Pallas kernel -------------------------
def _autoshape_kernel(x_ref, p_ref,
                      boxes_ref, scores_ref, cls_ref, keep_ref,
                      iou_scr, bT_scr):
    # ---- preprocess (/255) + 1x1-conv detection head (VPU rank-1 FMAs) ----
    x = x_ref[0].astype(jnp.float32) * (1.0 / 255.0)           # (C, HW)
    params = p_ref[...]                                        # (NO, C+2) single DMA
    w = params[:, 0:C]                                         # (NO, C)
    b = params[:, C:C + 1]                                     # (NO, 1)
    scale = params[:, C + 1:C + 2]                             # (NO, 1)

    raw = w[:, 0:1] * x[0:1, :]
    for c in range(1, C):                                      # C=3, unrolled
        raw = raw + w[:, c:c + 1] * x[c:c + 1, :]
    raw = raw + b                                              # (NO, HW)
    pred = jax.nn.sigmoid(raw) * scale                         # per-row scaling

    # ---- decode: xywh->xyxy, obj*cls confidence, best class, conf mask ----
    cx, cy = pred[0:1, :], pred[1:2, :]
    bw, bh = pred[2:3, :], pred[3:4, :]
    obj = pred[4:5, :]
    cls_scores = pred[5:NO, :]                                 # (NC, HW)

    cls_conf = jnp.max(cls_scores, axis=0, keepdims=True)      # (1, HW)
    # first index achieving the max (matches torch.max tie-breaking)
    row_idx = jax.lax.broadcasted_iota(jnp.int32, (NC, HW), 0)
    cls_idx = jnp.min(jnp.where(cls_scores == cls_conf, row_idx, NC),
                      axis=0, keepdims=True)                   # (1, HW) int32
    cls_f = cls_idx.astype(jnp.float32)

    conf = obj * cls_conf
    keepm = jnp.logical_and(obj > CONF_THRES, conf > CONF_THRES)
    score = jnp.where(keepm, conf, 0.0)                        # (1, HW), >= 0

    x1 = cx - bw * 0.5
    y1 = cy - bh * 0.5
    x2 = cx + bw * 0.5
    y2 = cy + bh * 0.5

    boxes_ref[0] = jnp.concatenate([x1, y1, x2, y2], axis=0)   # (4, HW)
    scores_ref[0] = score                                      # (1, HW)
    cls_ref[0] = cls_f                                         # (1, HW)

    # ---- class-aware offset boxes -----------------------------------------
    off = cls_f * MAX_WH
    bo = jnp.concatenate([x1 + off, y1 + off, x2 + off, y2 + off], axis=0)  # (4, HW)
    bo8 = jnp.concatenate([bo, bo], axis=0)                    # (8, HW), aligned
    bT_scr[...] = jnp.transpose(bo8)                           # one XLU transpose -> (HW, 8)

    x1_j, y1_j = bo[0:1, :], bo[1:2, :]                        # (1, HW) row operands
    x2_j, y2_j = bo[2:3, :], bo[3:4, :]
    area_j = (x2_j - x1_j) * (y2_j - y1_j)                     # (1, HW)

    # ---- pairwise IoU in 32-row strips (bounds live temporaries) ----------
    @pl.loop(0, HW // STRIP)
    def _(s):
        r = pl.multiple_of(s * STRIP, STRIP)
        cols = bT_scr[pl.ds(r, STRIP), :]                      # (STRIP, 8)
        x1_i, y1_i = cols[:, 0:1], cols[:, 1:2]                # (STRIP, 1) columns
        x2_i, y2_i = cols[:, 2:3], cols[:, 3:4]
        iw = jnp.maximum(jnp.minimum(x2_i, x2_j) - jnp.maximum(x1_i, x1_j), 0.0)
        ih = jnp.maximum(jnp.minimum(y2_i, y2_j) - jnp.maximum(y1_i, y1_j), 0.0)
        inter = iw * ih                                        # (STRIP, HW)
        area_i = (x2_i - x1_i) * (y2_i - y1_i)                 # (STRIP, 1)
        union = area_i + area_j - inter + 1e-9
        iou_scr[pl.ds(r, STRIP), :] = inter * pl.reciprocal(union, approx=True)

    # ---- greedy class-aware NMS: register-carried state, fused max/argmax,
    # ---- early exit once no live candidate remains -------------------------
    lane = jax.lax.broadcasted_iota(jnp.int32, (1, HW), 1)
    klane = jax.lax.broadcasted_iota(jnp.int32, (1, KEEP), 1)

    # Pack score + lane into one int32: scores are >= 0, so their int bit
    # patterns order identically to the floats. Low 8 bits carry (HW-1-lane)
    # so a single max gives "highest score, lowest lane on ties".
    score_bits = pltpu.bitcast(score, jnp.int32)
    packed0 = jnp.where(score > 0.0,
                        (score_bits & jnp.int32(-256)) | ((HW - 1) - lane),
                        0).astype(jnp.int32)                   # (1, HW) int32
    best0 = jnp.max(packed0)                                   # one reduction

    def cond(state):
        t, best, _, _ = state
        return jnp.logical_and(t < KEEP, best >= 256)          # 256 == "no live score"

    def body(state):
        t, best, live, keep_vec = state
        idx = (HW - 1) - (best & 0xFF)                         # scalar argmax (unpack)
        keep_vec = jnp.where(klane == t, idx, keep_vec)        # register update
        iou_row = iou_scr[pl.ds(idx, 1), :]                    # (1, HW)
        kill = jnp.logical_or(iou_row > IOU_THRES, lane == idx)
        live = jnp.where(kill, 0, live)
        best = jnp.max(live)                                   # single fused max+argmax
        return t + 1, best, live, keep_vec

    init_keep = jnp.full((1, KEEP), -1, dtype=jnp.int32)
    _, _, _, keep_final = jax.lax.while_loop(
        cond, body, (jnp.int32(0), best0, packed0, init_keep))
    keep_ref[0] = keep_final                                   # single HBM write


# ------------------------------- pallas_call wrapper ------------------------
def run_autoshape_kernel(x_cf, params):
    return pl.pallas_call(
        _autoshape_kernel,
        out_shape=(
            jax.ShapeDtypeStruct((N, 4, HW), jnp.float32),     # boxes (xyxy)
            jax.ShapeDtypeStruct((N, 1, HW), jnp.float32),     # conf scores
            jax.ShapeDtypeStruct((N, 1, HW), jnp.float32),     # class id (float)
            jax.ShapeDtypeStruct((N, 1, KEEP), jnp.int32),     # kept indices
        ),
        grid=(N,),
        in_specs=[
            pl.BlockSpec((1, C, HW), lambda i: (i, 0, 0)),
            pl.BlockSpec((NO, C + 2), lambda i: (0, 0)),       # merged w|b|scale
        ],
        out_specs=[
            pl.BlockSpec((1, 4, HW), lambda i: (i, 0, 0)),
            pl.BlockSpec((1, 1, HW), lambda i: (i, 0, 0)),
            pl.BlockSpec((1, 1, HW), lambda i: (i, 0, 0)),
            pl.BlockSpec((1, 1, KEEP), lambda i: (i, 0, 0)),
        ],
        scratch_shapes=[
            pltpu.VMEM((HW, HW), jnp.float32),                 # pairwise IoU
            pltpu.VMEM((HW, 8), jnp.float32),                  # transposed offset boxes
        ],
        compiler_params=pltpu.CompilerParams(
            dimension_semantics=("parallel",)),                # 2 TCs on v7x
    )(x_cf, params)


# ------------------------------ JAX glue ------------------------------------
def _xyxy2xywh(x):
    cx = (x[:, 0] + x[:, 2]) * 0.5
    cy = (x[:, 1] + x[:, 3]) * 0.5
    w = x[:, 2] - x[:, 0]
    h = x[:, 3] - x[:, 1]
    return jnp.stack([cx, cy, w, h], axis=-1)


def autoshape_forward(imgs_hwc, params):
    """Full autoShape pipeline on already-letterboxed HWC uint8-like images."""
    # --- preprocess layout (numpy path of autoShape.forward): HWC -> NCHW ---
    # TODO(synk): at real resolutions feed uint8 channels-last and do layout
    # + /255 in-kernel to cut the image DMA 4x and drop this transpose pass.
    x_nchw = jnp.transpose(imgs_hwc, (0, 3, 1, 2))             # (N, C, H, W)
    x_cf = x_nchw.reshape(N, C, HW)                            # channels-first, HW on lanes

    # --- fused model head + decode + IoU + greedy NMS (Pallas) ---
    boxes, scores, cls, keep = run_autoshape_kernel(x_cf, params)
    boxes_r = jnp.transpose(boxes, (0, 2, 1))                  # (N, HW, 4)
    scores_r = scores[:, 0, :]                                 # (N, HW)
    cls_r = cls[:, 0, :]                                       # (N, HW)
    keep_r = keep[:, 0, :]                                     # (N, KEEP) int32

    def gather_one(bx, sc, cl, kp):
        valid = kp >= 0
        idx = jnp.where(valid, kp, 0)
        bsel = bx[idx]                                         # (KEEP, 4)
        # scale_coords with identical shapes -> gain=1, pad=0; just clip.
        bsel = jnp.stack([
            jnp.clip(bsel[:, 0], 0.0, float(W)),
            jnp.clip(bsel[:, 1], 0.0, float(H)),
            jnp.clip(bsel[:, 2], 0.0, float(W)),
            jnp.clip(bsel[:, 3], 0.0, float(H)),
        ], axis=-1)
        det = jnp.concatenate([bsel, sc[idx][:, None], cl[idx][:, None]], axis=-1)
        det = jnp.where(valid[:, None], det, 0.0)
        return det, valid

    dets, valid = jax.vmap(gather_one)(boxes_r, scores_r, cls_r, keep_r)

    # --- Detections-style outputs (xyxy + xywh, normalized variants) ---
    gn = jnp.array([W, H, W, H, 1.0, 1.0], dtype=jnp.float32)
    xyxy = dets
    xywh = jnp.concatenate(
        [jax.vmap(_xyxy2xywh)(dets[..., :4]), dets[..., 4:]], axis=-1)
    return {"xyxy": xyxy, "xywh": xywh, "xyxyn": xyxy / gn, "xywhn": xywh / gn,
            "num_valid": valid.sum(axis=-1)}


# ------------------------------- main ---------------------------------------
if __name__ == "__main__":
    key = jax.random.PRNGKey(0)
    k_img, k_w, k_b = jax.random.split(key, 3)

    # synthetic letterboxed RGB images, values in [0, 256) like uint8 pixels
    imgs = jnp.floor(jax.random.uniform(k_img, (N, H, W, C),
                                        minval=0.0, maxval=256.0)).astype(jnp.float32)

    # deterministic synthetic detection-head parameters (1x1 conv: C -> NO),
    # stored output-major so the kernel consumes them in (NO, *) layout.
    w = jax.random.normal(k_w, (NO, C), dtype=jnp.float32) * 0.5
    b = jax.random.normal(k_b, (NO, 1), dtype=jnp.float32) * 0.1
    # per-output scales: cx,cy in [0,W/H]; w,h up to half the image; obj/cls in [0,1]
    scale_vals = [float(W), float(H), float(W) * 0.5, float(H) * 0.5, 1.0] + [1.0] * NC
    scale = jnp.array(scale_vals, dtype=jnp.float32).reshape(NO, 1)

    # merged (NO, C+2) parameter block: [ w | b | scale ]
    params = jnp.concatenate([w, b, scale], axis=1)

    out = jax.jit(autoshape_forward)(imgs, params)
    jax.tree_util.tree_map(jax.block_until_ready, out)
    print("KERNEL_OK")
</pallas_src>

<mosaic_0001>
module attributes {stable_mosaic.version = 11 : i64} {
  func.func @_autoshape_kernel(%arg0: i32, %arg1: memref<1x3x256xf32, #tpu.memory_space<vmem>>, %arg2: memref<8x5xf32, #tpu.memory_space<vmem>>, %arg3: memref<1x4x256xf32, #tpu.memory_space<vmem>>, %arg4: memref<1x1x256xf32, #tpu.memory_space<vmem>>, %arg5: memref<1x1x256xf32, #tpu.memory_space<vmem>>, %arg6: memref<1x1x256xi32, #tpu.memory_space<vmem>>, %arg7: memref<256x256xf32, #tpu.memory_space<vmem>>, %arg8: memref<256x8xf32, #tpu.memory_space<vmem>>) attributes {dimension_semantics = [#tpu.dimension_semantics<parallel>], iteration_bounds = array<i64: 2>, scalar_prefetch = 0 : i64, scratch_operands = 2 : i64, tpu.core_type = #tpu.core_type<tc>, window_params = [{transform_indices = @transform_0, window_bounds = array<i64: 1, 3, 256>}, {pipeline_mode = #tpu.pipeline_mode<synchronous>, transform_indices = @transform_1, window_bounds = array<i64: 8, 5>}, {transform_indices = @transform_2, window_bounds = array<i64: 1, 4, 256>}, {transform_indices = @transform_3, window_bounds = array<i64: 1, 1, 256>}, {transform_indices = @transform_4, window_bounds = array<i64: 1, 1, 256>}, {transform_indices = @transform_5, window_bounds = array<i64: 1, 1, 256>}]} {
    %c0 = arith.constant 0 : index
    %c0_0 = arith.constant 0 : index
    %c0_1 = arith.constant 0 : index
    %0 = vector.load %arg1[%c0, %c0_0, %c0_1] : memref<1x3x256xf32, #tpu.memory_space<vmem>>, vector<1x3x256xf32>
    %1 = vector.shape_cast %0 : vector<1x3x256xf32> to vector<3x256xf32>
    %cst = arith.constant 0.00392156886 : f32
    %2 = vector.broadcast %cst : f32 to vector<3x256xf32>
    %3 = arith.mulf %1, %2 : vector<3x256xf32>
    %c0_2 = arith.constant 0 : index
    %c0_3 = arith.constant 0 : index
    %4 = vector.load %arg2[%c0_2, %c0_3] : memref<8x5xf32, #tpu.memory_space<vmem>>, vector<8x5xf32>
    %5 = vector.extract_strided_slice %4 {offsets = [0, 0], sizes = [8, 3], strides = [1, 1]} : vector<8x5xf32> to vector<8x3xf32>
    %6 = vector.extract_strided_slice %4 {offsets = [0, 3], sizes = [8, 1], strides = [1, 1]} : vector<8x5xf32> to vector<8x1xf32>
    %7 = vector.extract_strided_slice %4 {offsets = [0, 4], sizes = [8, 1], strides = [1, 1]} : vector<8x5xf32> to vector<8x1xf32>
    %8 = vector.extract_strided_slice %5 {offsets = [0, 0], sizes = [8, 1], strides = [1, 1]} : vector<8x3xf32> to vector<8x1xf32>
    %9 = vector.extract_strided_slice %3 {offsets = [0, 0], sizes = [1, 256], strides = [1, 1]} : vector<3x256xf32> to vector<1x256xf32>
    %10 = vector.broadcast %8 : vector<8x1xf32> to vector<8x256xf32>
    %11 = vector.broadcast %9 : vector<1x256xf32> to vector<8x256xf32>
    %12 = arith.mulf %10, %11 : vector<8x256xf32>
    %13 = vector.extract_strided_slice %5 {offsets = [0, 1], sizes = [8, 1], strides = [1, 1]} : vector<8x3xf32> to vector<8x1xf32>
    %14 = vector.extract_strided_slice %3 {offsets = [1, 0], sizes = [1, 256], strides = [1, 1]} : vector<3x256xf32> to vector<1x256xf32>
    %15 = vector.broadcast %13 : vector<8x1xf32> to vector<8x256xf32>
    %16 = vector.broadcast %14 : vector<1x256xf32> to vector<8x256xf32>
    %17 = arith.mulf %15, %16 : vector<8x256xf32>
    %18 = arith.addf %12, %17 : vector<8x256xf32>
    %19 = vector.extract_strided_slice %5 {offsets = [0, 2], sizes = [8, 1], strides = [1, 1]} : vector<8x3xf32> to vector<8x1xf32>
    %20 = vector.extract_strided_slice %3 {offsets = [2, 0], sizes = [1, 256], strides = [1, 1]} : vector<3x256xf32> to vector<1x256xf32>
    %21 = vector.broadcast %19 : vector<8x1xf32> to vector<8x256xf32>
    %22 = vector.broadcast %20 : vector<1x256xf32> to vector<8x256xf32>
    %23 = arith.mulf %21, %22 : vector<8x256xf32>
    %24 = arith.addf %18, %23 : vector<8x256xf32>
    %25 = vector.broadcast %6 : vector<8x1xf32> to vector<8x256xf32>
    %26 = arith.addf %24, %25 : vector<8x256xf32>
    %27 = arith.negf %26 : vector<8x256xf32>
    %28 = math.exp %27 : vector<8x256xf32>
    %cst_4 = arith.constant 1.000000e+00 : f32
    %29 = vector.broadcast %cst_4 : f32 to vector<8x256xf32>
    %30 = arith.addf %29, %28 : vector<8x256xf32>
    %31 = arith.divf %29, %30 : vector<8x256xf32>
    %32 = vector.broadcast %7 : vector<8x1xf32> to vector<8x256xf32>
    %33 = arith.mulf %31, %32 : vector<8x256xf32>
    %34 = vector.extract_strided_slice %33 {offsets = [0, 0], sizes = [1, 256], strides = [1, 1]} : vector<8x256xf32> to vector<1x256xf32>
    %35 = vector.extract_strided_slice %33 {offsets = [1, 0], sizes = [1, 256], strides = [1, 1]} : vector<8x256xf32> to vector<1x256xf32>
    %36 = vector.extract_strided_slice %33 {offsets = [2, 0], sizes = [1, 256], strides = [1, 1]} : vector<8x256xf32> to vector<1x256xf32>
    %37 = vector.extract_strided_slice %33 {offsets = [3, 0], sizes = [1, 256], strides = [1, 1]} : vector<8x256xf32> to vector<1x256xf32>
    %38 = vector.extract_strided_slice %33 {offsets = [4, 0], sizes = [1, 256], strides = [1, 1]} : vector<8x256xf32> to vector<1x256xf32>
    %39 = vector.extract_strided_slice %33 {offsets = [5, 0], sizes = [3, 256], strides = [1, 1]} : vector<8x256xf32> to vector<3x256xf32>
    %cst_5 = arith.constant dense<0xFF800000> : vector<256xf32>
    %40 = vector.multi_reduction <maximumf>, %39, %cst_5 [0] : vector<3x256xf32> to vector<256xf32>
    %41 = vector.shape_cast %40 : vector<256xf32> to vector<1x256xf32>
    %42 = tpu.iota {dimensions = array<i32: 0>} : vector<3x256xi32>
    %43 = vector.broadcast %41 : vector<1x256xf32> to vector<3x256xf32>
    %44 = arith.cmpf oeq, %39, %43 : vector<3x256xf32>
    %c3_i32 = arith.constant 3 : i32
    %45 = vector.broadcast %c3_i32 : i32 to vector<3x256xi32>
    %46 = arith.select %44, %42, %45 : vector<3x256xi1>, vector<3x256xi32>
    %cst_6 = arith.constant dense<2147483647> : vector<256xi32>
    %47 = vector.multi_reduction <minsi>, %46, %cst_6 [0] : vector<3x256xi32> to vector<256xi32>
    %48 = vector.shape_cast %47 : vector<256xi32> to vector<1x256xi32>
    %49 = arith.sitofp %48 : vector<1x256xi32> to vector<1x256xf32>
    %50 = arith.mulf %38, %41 : vector<1x256xf32>
    %cst_7 = arith.constant 2.500000e-01 : f32
    %51 = vector.broadcast %cst_7 : f32 to vector<1x256xf32>
    %52 = arith.cmpf ogt, %38, %51 : vector<1x256xf32>
    %cst_8 = arith.constant 2.500000e-01 : f32
    %53 = vector.broadcast %cst_8 : f32 to vector<1x256xf32>
    %54 = arith.cmpf ogt, %50, %53 : vector<1x256xf32>
    %55 = arith.andi %52, %54 : vector<1x256xi1>
    %cst_9 = arith.constant 0.000000e+00 : f32
    %56 = vector.broadcast %cst_9 : f32 to vector<1x256xf32>
    %57 = arith.select %55, %50, %56 : vector<1x256xi1>, vector<1x256xf32>
    %cst_10 = arith.constant 5.000000e-01 : f32
    %58 = vector.broadcast %cst_10 : f32 to vector<1x256xf32>
    %59 = arith.mulf %36, %58 : vector<1x256xf32>
    %60 = arith.subf %34, %59 : vector<1x256xf32>
    %cst_11 = arith.constant 5.000000e-01 : f32
    %61 = vector.broadcast %cst_11 : f32 to vector<1x256xf32>
    %62 = arith.mulf %37, %61 : vector<1x256xf32>
    %63 = arith.subf %35, %62 : vector<1x256xf32>
    %cst_12 = arith.constant 5.000000e-01 : f32
    %64 = vector.broadcast %cst_12 : f32 to vector<1x256xf32>
    %65 = arith.mulf %36, %64 : vector<1x256xf32>
    %66 = arith.addf %34, %65 : vector<1x256xf32>
    %cst_13 = arith.constant 5.000000e-01 : f32
    %67 = vector.broadcast %cst_13 : f32 to vector<1x256xf32>
    %68 = arith.mulf %37, %67 : vector<1x256xf32>
    %69 = arith.addf %35, %68 : vector<1x256xf32>
    %70 = tpu.concatenate %60, %63, %66, %69 in 0 : vector<1x256xf32>, vector<1x256xf32>, vector<1x256xf32>, vector<1x256xf32> -> vector<4x256xf32>
    %c0_14 = arith.constant 0 : index
    %c0_15 = arith.constant 0 : index
    %c0_16 = arith.constant 0 : index
    %71 = vector.load %arg3[%c0_14, %c0_15, %c0_16] : memref<1x4x256xf32, #tpu.memory_space<vmem>>, vector<1x4x256xf32>
    %72 = vector.shape_cast %71 : vector<1x4x256xf32> to vector<4x256xf32>
    %73 = vector.shape_cast %70 : vector<4x256xf32> to vector<1x4x256xf32>
    tpu.vector_store %arg3[%c0_14, %c0_15, %c0_16], %73 {strides = array<i32>} : memref<1x4x256xf32, #tpu.memory_space<vmem>>, vector<1x4x256xf32>,
    %c0_17 = arith.constant 0 : index
    %c0_18 = arith.constant 0 : index
    %c0_19 = arith.constant 0 : index
    %74 = vector.load %arg4[%c0_17, %c0_18, %c0_19] : memref<1x1x256xf32, #tpu.memory_space<vmem>>, vector<1x1x256xf32>
    %75 = vector.shape_cast %74 : vector<1x1x256xf32> to vector<1x256xf32>
    %76 = vector.shape_cast %57 : vector<1x256xf32> to vector<1x1x256xf32>
    tpu.vector_store %arg4[%c0_17, %c0_18, %c0_19], %76 {strides = array<i32>} : memref<1x1x256xf32, #tpu.memory_space<vmem>>, vector<1x1x256xf32>,
    %c0_20 = arith.constant 0 : index
    %c0_21 = arith.constant 0 : index
    %c0_22 = arith.constant 0 : index
    %77 = vector.load %arg5[%c0_20, %c0_21, %c0_22] : memref<1x1x256xf32, #tpu.memory_space<vmem>>, vector<1x1x256xf32>
    %78 = vector.shape_cast %77 : vector<1x1x256xf32> to vector<1x256xf32>
    %79 = vector.shape_cast %49 : vector<1x256xf32> to vector<1x1x256xf32>
    tpu.vector_store %arg5[%c0_20, %c0_21, %c0_22], %79 {strides = array<i32>} : memref<1x1x256xf32, #tpu.memory_space<vmem>>, vector<1x1x256xf32>,
    %cst_23 = arith.constant 4.096000e+03 : f32
    %80 = vector.broadcast %cst_23 : f32 to vector<1x256xf32>
    %81 = arith.mulf %49, %80 : vector<1x256xf32>
    %82 = arith.addf %60, %81 : vector<1x256xf32>
    %83 = arith.addf %63, %81 : vector<1x256xf32>
    %84 = arith.addf %66, %81 : vector<1x256xf32>
    %85 = arith.addf %69, %81 : vector<1x256xf32>
    %86 = tpu.concatenate %82, %83, %84, %85 in 0 : vector<1x256xf32>, vector<1x256xf32>, vector<1x256xf32>, vector<1x256xf32> -> vector<4x256xf32>
    %87 = tpu.concatenate %86, %86 in 0 : vector<4x256xf32>, vector<4x256xf32> -> vector<8x256xf32>
    %88 = tpu.transpose %87, [1, 0] : vector<8x256xf32> -> vector<256x8xf32>
    %c0_24 = arith.constant 0 : index
    %c0_25 = arith.constant 0 : index
    %89 = vector.load %arg8[%c0_24, %c0_25] : memref<256x8xf32, #tpu.memory_space<vmem>>, vector<256x8xf32>
    tpu.vector_store %arg8[%c0_24, %c0_25], %88 {strides = array<i32>} : memref<256x8xf32, #tpu.memory_space<vmem>>, vector<256x8xf32>,
    %90 = vector.extract_strided_slice %86 {offsets = [0, 0], sizes = [1, 256], strides = [1, 1]} : vector<4x256xf32> to vector<1x256xf32>
    %91 = vector.extract_strided_slice %86 {offsets = [1, 0], sizes = [1, 256], strides = [1, 1]} : vector<4x256xf32> to vector<1x256xf32>
    %92 = vector.extract_strided_slice %86 {offsets = [2, 0], sizes = [1, 256], strides = [1, 1]} : vector<4x256xf32> to vector<1x256xf32>
    %93 = vector.extract_strided_slice %86 {offsets = [3, 0], sizes = [1, 256], strides = [1, 1]} : vector<4x256xf32> to vector<1x256xf32>
    %94 = arith.subf %92, %90 : vector<1x256xf32>
    %95 = arith.subf %93, %91 : vector<1x256xf32>
    %96 = arith.mulf %94, %95 : vector<1x256xf32>
    %c0_i32 = arith.constant 0 : i32
    %c8_i32 = arith.constant 8 : i32
    %97 = arith.addi %c0_i32, %c8_i32 : i32
    %c1_i32 = arith.constant 1 : i32
    scf.for %arg9 = %c0_i32 to %97 step %c1_i32  : i32 {
      %c1_i32_34 = arith.constant 1 : i32
      %119 = arith.muli %arg9, %c1_i32_34 : i32
      %c0_i32_35 = arith.constant 0 : i32
      %120 = arith.addi %c0_i32_35, %119 : i32
      %c32_i32 = arith.constant 32 : i32
      %121 = arith.muli %120, %c32_i32 : i32
      %122 = tpu.assume_multiple %121, 32 : i32
      %123 = arith.index_cast %122 : i32 to index
      %c0_36 = arith.constant 0 : index
      %124 = vector.load %arg8[%123, %c0_36] : memref<256x8xf32, #tpu.memory_space<vmem>>, vector<32x8xf32>
      %125 = vector.extract_strided_slice %124 {offsets = [0, 0], sizes = [32, 1], strides = [1, 1]} : vector<32x8xf32> to vector<32x1xf32>
      %126 = vector.extract_strided_slice %124 {offsets = [0, 1], sizes = [32, 1], strides = [1, 1]} : vector<32x8xf32> to vector<32x1xf32>
      %127 = vector.extract_strided_slice %124 {offsets = [0, 2], sizes = [32, 1], strides = [1, 1]} : vector<32x8xf32> to vector<32x1xf32>
      %128 = vector.extract_strided_slice %124 {offsets = [0, 3], sizes = [32, 1], strides = [1, 1]} : vector<32x8xf32> to vector<32x1xf32>
      %129 = vector.broadcast %127 : vector<32x1xf32> to vector<32x256xf32>
      %130 = vector.broadcast %92 : vector<1x256xf32> to vector<32x256xf32>
      %131 = arith.minimumf %129, %130 : vector<32x256xf32>
      %132 = vector.broadcast %125 : vector<32x1xf32> to vector<32x256xf32>
      %133 = vector.broadcast %90 : vector<1x256xf32> to vector<32x256xf32>
      %134 = arith.maximumf %132, %133 : vector<32x256xf32>
      %135 = arith.subf %131, %134 : vector<32x256xf32>
      %cst_37 = arith.constant 0.000000e+00 : f32
      %136 = vector.broadcast %cst_37 : f32 to vector<32x256xf32>
      %137 = arith.maximumf %135, %136 : vector<32x256xf32>
      %138 = vector.broadcast %128 : vector<32x1xf32> to vector<32x256xf32>
      %139 = vector.broadcast %93 : vector<1x256xf32> to vector<32x256xf32>
      %140 = arith.minimumf %138, %139 : vector<32x256xf32>
      %141 = vector.broadcast %126 : vector<32x1xf32> to vector<32x256xf32>
      %142 = vector.broadcast %91 : vector<1x256xf32> to vector<32x256xf32>
      %143 = arith.maximumf %141, %142 : vector<32x256xf32>
      %144 = arith.subf %140, %143 : vector<32x256xf32>
      %cst_38 = arith.constant 0.000000e+00 : f32
      %145 = vector.broadcast %cst_38 : f32 to vector<32x256xf32>
      %146 = arith.maximumf %144, %145 : vector<32x256xf32>
      %147 = arith.mulf %137, %146 : vector<32x256xf32>
      %148 = arith.subf %127, %125 : vector<32x1xf32>
      %149 = arith.subf %128, %126 : vector<32x1xf32>
      %150 = arith.mulf %148, %149 : vector<32x1xf32>
      %151 = vector.broadcast %150 : vector<32x1xf32> to vector<32x256xf32>
      %152 = vector.broadcast %96 : vector<1x256xf32> to vector<32x256xf32>
      %153 = arith.addf %151, %152 : vector<32x256xf32>
      %154 = arith.subf %153, %147 : vector<32x256xf32>
      %cst_39 = arith.constant 9.99999971E-10 : f32
      %155 = vector.broadcast %cst_39 : f32 to vector<32x256xf32>
      %156 = arith.addf %154, %155 : vector<32x256xf32>
      %157 = tpu.reciprocal %156 {approx = true} : vector<32x256xf32> -> vector<32x256xf32>
      %158 = arith.mulf %147, %157 : vector<32x256xf32>
      %159 = arith.index_cast %122 : i32 to index
      %c0_40 = arith.constant 0 : index
      %160 = vector.load %arg7[%159, %c0_40] : memref<256x256xf32, #tpu.memory_space<vmem>>, vector<32x256xf32>
      tpu.vector_store %arg7[%159, %c0_40], %158 {strides = array<i32>} : memref<256x256xf32, #tpu.memory_space<vmem>>, vector<32x256xf32>,
    }
    %c8_i32_26 = arith.constant 8 : i32
    %98 = tpu.iota {dimensions = array<i32: 1>} : vector<1x256xi32>
    %99 = tpu.iota {dimensions = array<i32: 1>} : vector<1x256xi32>
    %100 = tpu.bitcast %57 : vector<1x256xf32> -> vector<1x256xi32>
    %cst_27 = arith.constant 0.000000e+00 : f32
    %101 = vector.broadcast %cst_27 : f32 to vector<1x256xf32>
    %102 = arith.cmpf ogt, %57, %101 : vector<1x256xf32>
    %c-256_i32 = arith.constant -256 : i32
    %103 = vector.broadcast %c-256_i32 : i32 to vector<1x256xi32>
    %104 = arith.andi %100, %103 : vector<1x256xi32>
    %c255_i32 = arith.constant 255 : i32
    %105 = vector.broadcast %c255_i32 : i32 to vector<1x256xi32>
    %106 = arith.subi %105, %98 : vector<1x256xi32>
    %107 = arith.ori %104, %106 : vector<1x256xi32>
    %c0_i32_28 = arith.constant 0 : i32
    %108 = vector.broadcast %c0_i32_28 : i32 to vector<1x256xi32>
    %109 = arith.select %102, %107, %108 : vector<1x256xi1>, vector<1x256xi32>
    %110 = vector.shape_cast %109 : vector<1x256xi32> to vector<1x1x256xi32>
    %cst_29 = arith.constant dense<-2147483648> : vector<1xi32>
    %111 = vector.multi_reduction <maxsi>, %110, %cst_29 [1, 2] : vector<1x1x256xi32> to vector<1xi32>
    %112 = vector.shape_cast %111 : vector<1xi32> to vector<1x1x1xi32>
    %113 = vector.extract %112[0, 0, 0] : i32 from vector<1x1x1xi32>
    %c-1_i32 = arith.constant -1 : i32
    %114 = vector.broadcast %c-1_i32 : i32 to vector<1x256xi32>
    %c0_i32_30 = arith.constant 0 : i32
    %115:4 = scf.while (%arg9 = %c0_i32_30, %arg10 = %113, %arg11 = %109, %arg12 = %114) : (i32, i32, vector<1x256xi32>, vector<1x256xi32>) -> (i32, i32, vector<1x256xi32>, vector<1x256xi32>) {
      %c256_i32 = arith.constant 256 : i32
      %119 = arith.cmpi slt, %arg9, %c256_i32 : i32
      %c256_i32_34 = arith.constant 256 : i32
      %120 = arith.cmpi sge, %arg10, %c256_i32_34 : i32
      %121 = arith.andi %119, %120 : i1
      scf.condition(%121) %arg9, %arg10, %arg11, %arg12 : i32, i32, vector<1x256xi32>, vector<1x256xi32>
    } do {
    ^bb0(%arg9: i32, %arg10: i32, %arg11: vector<1x256xi32>, %arg12: vector<1x256xi32>):
      %c255_i32_34 = arith.constant 255 : i32
      %119 = arith.andi %arg10, %c255_i32_34 : i32
      %c255_i32_35 = arith.constant 255 : i32
      %120 = arith.subi %c255_i32_35, %119 : i32
      %121 = vector.broadcast %arg9 : i32 to vector<1x256xi32>
      %122 = arith.cmpi eq, %99, %121 : vector<1x256xi32>
      %123 = vector.broadcast %120 : i32 to vector<1x256xi32>
      %124 = arith.select %122, %123, %arg12 : vector<1x256xi1>, vector<1x256xi32>
      %125 = arith.index_cast %120 : i32 to index
      %c0_36 = arith.constant 0 : index
      %126 = vector.load %arg7[%125, %c0_36] : memref<256x256xf32, #tpu.memory_space<vmem>>, vector<1x256xf32>
      %cst_37 = arith.constant 4.500000e-01 : f32
      %127 = vector.broadcast %cst_37 : f32 to vector<1x256xf32>
      %128 = arith.cmpf ogt, %126, %127 : vector<1x256xf32>
      %129 = vector.broadcast %120 : i32 to vector<1x256xi32>
      %130 = arith.cmpi eq, %98, %129 : vector<1x256xi32>
      %131 = arith.ori %128, %130 : vector<1x256xi1>
      %c0_i32_38 = arith.constant 0 : i32
      %132 = vector.broadcast %c0_i32_38 : i32 to vector<1x256xi32>
      %133 = arith.select %131, %132, %arg11 : vector<1x256xi1>, vector<1x256xi32>
      %134 = vector.shape_cast %133 : vector<1x256xi32> to vector<1x1x256xi32>
      %cst_39 = arith.constant dense<-2147483648> : vector<1xi32>
      %135 = vector.multi_reduction <maxsi>, %134, %cst_39 [1, 2] : vector<1x1x256xi32> to vector<1xi32>
      %136 = vector.shape_cast %135 : vector<1xi32> to vector<1x1x1xi32>
      %137 = vector.extract %136[0, 0, 0] : i32 from vector<1x1x1xi32>
      %c1_i32_40 = arith.constant 1 : i32
      %138 = arith.addi %arg9, %c1_i32_40 : i32
      scf.yield %138, %137, %133, %124 : i32, i32, vector<1x256xi32>, vector<1x256xi32>
    }
    %c0_31 = arith.constant 0 : index
    %c0_32 = arith.constant 0 : index
    %c0_33 = arith.constant 0 : index
    %116 = vector.load %arg6[%c0_31, %c0_32, %c0_33] : memref<1x1x256xi32, #tpu.memory_space<vmem>>, vector<1x1x256xi32>
    %117 = vector.shape_cast %116 : vector<1x1x256xi32> to vector<1x256xi32>
    %118 = vector.shape_cast %115#3 : vector<1x256xi32> to vector<1x1x256xi32>
    tpu.vector_store %arg6[%c0_31, %c0_32, %c0_33], %118 {strides = array<i32>} : memref<1x1x256xi32, #tpu.memory_space<vmem>>, vector<1x1x256xi32>,
    return
  }
  func.func @transform_0(%arg0: i32) -> (i32, i32, i32) {
    %c0_i32 = arith.constant 0 : i32
    %c0_i32_0 = arith.constant 0 : i32
    %c0_i32_1 = arith.constant 0 : i32
    return %arg0, %c0_i32, %c0_i32_0 : i32, i32, i32
  }
  func.func @transform_1(%arg0: i32) -> (i32, i32) {
    %c0_i32 = arith.constant 0 : i32
    %c0_i32_0 = arith.constant 0 : i32
    %c0_i32_1 = arith.constant 0 : i32
    return %c0_i32, %c0_i32_0 : i32, i32
  }
  func.func @transform_2(%arg0: i32) -> (i32, i32, i32) {
    %c0_i32 = arith.constant 0 : i32
    %c0_i32_0 = arith.constant 0 : i32
    %c0_i32_1 = arith.constant 0 : i32
    return %arg0, %c0_i32, %c0_i32_0 : i32, i32, i32
  }
  func.func @transform_3(%arg0: i32) -> (i32, i32, i32) {
    %c0_i32 = arith.constant 0 : i32
    %c0_i32_0 = arith.constant 0 : i32
    %c0_i32_1 = arith.constant 0 : i32
    return %arg0, %c0_i32, %c0_i32_0 : i32, i32, i32
  }
  func.func @transform_4(%arg0: i32) -> (i32, i32, i32) {
    %c0_i32 = arith.constant 0 : i32
    %c0_i32_0 = arith.constant 0 : i32
    %c0_i32_1 = arith.constant 0 : i32
    return %arg0, %c0_i32, %c0_i32_0 : i32, i32, i32
  }
  func.func @transform_5(%arg0: i32) -> (i32, i32, i32) {
    %c0_i32 = arith.constant 0 : i32
    %c0_i32_0 = arith.constant 0 : i32
    %c0_i32_1 = arith.constant 0 : i32
    return %arg0, %c0_i32, %c0_i32_0 : i32, i32, i32
  }
}

</mosaic_0001>

<bundles_post_ra>
// kernel: autoshape_forward.1
= control target key start
LH: loop header
LB: loop body
LE: loop exit
PB: predicated region body
PF: predicated region fallthrough
CT: control target
= control target key end

     0   :  { %s1452_s18 = smov 0   ;;  %s1791_s0 = inlined_call_operand.vmem [shape: f32[2,3,256], index: 0, kind: input, shape index: {}]   ;;  %s1792_s1 = inlined_call_operand.vmem [shape: f32[8,5], index: 1, kind: input, shape index: {}]   ;;  %s1793_s2 = inlined_call_operand.vmem [shape: f32[2,4,256], index: 2, kind: output, shape index: {0}]   ;;  %s1794_s3 = inlined_call_operand.vmem [shape: f32[2,1,256], index: 3, kind: output, shape index: {1}]   ;;  %s1795_s4 = inlined_call_operand.vmem [shape: f32[2,1,256], index: 4, kind: output, shape index: {2}]   ;;  %s1796_s5 = inlined_call_operand.vmem [shape: s32[2,1,256], index: 5, kind: output, shape index: {3}]  }
   0x1 LB: > { %s1163_s19 = sadd.s32 4294967295, %s1372_s18   ;;  %p1167_p0 = scmp.ge.s32.totalorder %s1372_s18, 1  ;;  %s1372_s18 = sphi %s1452_s18, %s16_s18  }
   0x2   : > { %p194_p1 = scmp.lt.s32.totalorder %s1372_s18, 3 }
   0x4   : > { %p195_p2 = pnand %p1167_p0, %p194_p1 }
   0x5   : > { %p234_p3 = scmp.lt.s32.totalorder (!%p195_p2), %s1163_s19, 1  ;;  %s1587_s14 = smov (!%p195_p2), 0  }
   0x6   : > { %198 = sbr.rel (%p195_p2) target bundleno = 1533 (0x5fd), region = 28 }
   0xb   : > { %v258_v0 = vld [vmem:[%s1792_s1] sm:$0xff]  ;;  %v1410_v1 = vmov 0   ;;  %v1411_v2 = vmov 2   ;;  %v1412_v3 = vmov 4   ;;  %v1413_v4 = vmov 1   ;;  %s1805_s19 = smov (!%p234_p3, %s1163_s19), 1 }
   0xc   : > { %1287 = vset.pattern.permute.xlu0 %v1410_v1  ;;  %1289 = vset.pattern.permute.xlu1 %v1411_v2  ;;  %v1414_v5 = vmov 3   ;;  %s1466_s22 = sshll.u32 %s1805_s19, 1  ;;  %s1185_s26 = sshll.u32 %s1805_s19, 3  ;;  %vm351_vm8 = vcmask 1047557   ;;  %vm424_vm9 = vcmask 1041408   ;;  %vm427_vm10 = vcmask 1042432  }
   0xd   : > { %261 = vperm.xlu0 %1287, %v258_v0   ;;  %288 = vperm.xlu1 %1289, %v258_v0   ;;  %s255_s25 = scalar_lea.vmem %s1796_s5, %s1466_s22  ;;  %s238_s29 = scalar_lea.vmem %s1791_s0, %s1185_s26  ;;  %vm433_vm11 = vcmask 1043456  }
   0xe   : > { %1291 = vset.pattern.permute.xlu2 %v1412_v3  ;;  %v256_v6 = vld [vmem:[%s238_s29] sm:$0x77]  ;;  %s243_s7 = scalar_lea.vmem %s1793_s2, %s1185_s26  ;;  %s247_s10 = scalar_lea.vmem %s1794_s3, %s1466_s22 }
   0xf   : > { %346 = vperm.xlu2 %1291, %v258_v0   ;;  %v257_v7 = vmul.f32 0.003921569, %v256_v6  ;;  %s251_s13 = scalar_lea.vmem %s1795_s4, %s1466_s22 }
  0x11   : > { %v265_v9 = vperm.slane %v257_v7, 0  ;;  %v266_v10 = vperm.slane %v257_v7, 4  ;;  %v277_v11 = vperm.slane %v257_v7, 1  ;;  %v278_v12 = vperm.slane %v257_v7, 5 }
  0x12   : > { %v291_v14 = vperm.slane %v257_v7, 2  ;;  %v292_v15 = vperm.slane %v257_v7, 6  ;;  %v366_v7 = vlaneseq }
  0x13   : > { %v269_v16 = vperm.slane %v265_v9, 0  ;;  %v270_v17 = vperm.slane %v266_v10, 0  ;;  %v281_v18 = vperm.slane %v277_v11, 1  ;;  %v282_v19 = vperm.slane %v278_v12, 1 }
  0x14   : > { %v295_v20 = vperm.slane %v291_v14, 2  ;;  %v296_v21 = vperm.slane %v292_v15, 2 }
  0x15   : > { %1288 = vset.pattern.permute.xlu0 %v1413_v4  ;;  %1290 = vset.pattern.permute.xlu1 %v1414_v5 }
  0x16   : > { %274 = vperm.xlu0 %1288, %v258_v0   ;;  %302 = vperm.xlu1 %1290, %v258_v0  }
  0x1e   : > { %1292 = vset.pattern.permute.xlu0 %v1412_v3 }
  0x69   : > { %v347_v55 = vpop.permute.xlu2 %346 }
  0x7f   : > { %v262_v8 = vpop.permute.xlu0 %261  ;;  %v289_v13 = vpop.permute.xlu1 %288 }
  0x80   : > { %v271_v23 = vmul.f32 %v269_v16, %v262_v8  ;;  %v272_v24 = vmul.f32 %v270_v17, %v262_v8  ;;  %v297_v27 = vmul.f32 %v295_v20, %v289_v13  ;;  %v298_v28 = vmul.f32 %v296_v21, %v289_v13 }
  0x81   : > { %v367_v16 = vshrl.u32 %v366_v7, 7 }
  0x88   : > { %v275_v22 = vpop.permute.xlu0 %274  ;;  %v303_v31 = vpop.permute.xlu1 %302 }
  0x89   : > { %v283_v25 = vmul.f32 %v281_v18, %v275_v22  ;;  %v284_v26 = vmul.f32 %v282_v19, %v275_v22 }
  0x8b   : > { %v285_v29 = vadd.f32 %v283_v25, %v271_v23  ;;  %v286_v30 = vadd.f32 %v284_v26, %v272_v24 }
  0x8d   : > { %v299_v32 = vadd.f32 %v297_v27, %v285_v29  ;;  %v300_v33 = vadd.f32 %v298_v28, %v286_v30  ;;  %v370_v27 = vrot.slane %v367_v16, 3 }
  0x8f   : > { %v305_v34 = vadd.f32 %v303_v31, %v299_v32  ;;  %v306_v35 = vadd.f32 %v303_v31, %v300_v33 }
  0x91   : > { %v1175_v36 = vmul.f32 -1.442695, %v305_v34  ;;  %v1176_v37 = vmul.f32 -1.442695, %v306_v35 }
  0x93   : > { %1293 = vpow2.f32 %v1175_v36 }
  0x94   : > { %1295 = vpow2.f32 %v1176_v37 }
  0x99   : > { %v1294_v38 = vpop.eup %1293 }
  0x9a   : > { %v1296_v39 = vpop.eup %1295  ;;  %v313_v40 = vadd.f32 1.0, %v1294_v38 }
  0x9b   : > { %v314_v41 = vadd.f32 1.0, %v1296_v39 }
  0x9c   : > { %1297 = vrcp.f32 %v313_v40  ;;  %v326_v47 = vand.u32 2147483648, %v313_v40  ;;  %v324_v50 = vand.u32 2147483647, %v313_v40  ;;  %vm320_vm2 = vweird.f32 %v313_v40 }
  0x9d   : > { %1299 = vrcp.f32 %v314_v41  ;;  %v341_v51 = vand.u32 2147483648, %v314_v41  ;;  %v339_v53 = vand.u32 2147483647, %v314_v41  ;;  %vm335_vm4 = vweird.f32 %v314_v41 }
  0x9e   : > { %v327_v56 = vor.u32 1.1754944e-38, %v326_v47  ;;  %vm325_vm5 = vcmp.eq.f32.partialorder %v324_v50, 8.507059e+37 }
  0x9f   : > { %v342_v59 = vor.u32 1.1754944e-38, %v341_v51  ;;  %vm340_vm7 = vcmp.eq.f32.partialorder %v339_v53, 8.507059e+37 }
  0xa2   : > { %v1298_v42 = vpop.eup %1297 }
  0xa3   : > { %v1300_v43 = vpop.eup %1299  ;;  %v316_v44 = vmul.f32 %v1298_v42, %v313_v40  ;;  %vm321_vm0 = vweird.f32 %v1298_v42 }
  0xa4   : > { %v331_v45 = vmul.f32 %v1300_v43, %v314_v41  ;;  %vm336_vm1 = vweird.f32 %v1300_v43  ;;  %vm322_vm3 = vmor %vm320_vm2, %vm321_vm0 }
  0xa5   : > { %v317_v46 = vsub.f32 1.0, %v316_v44  ;;  %vm337_vm6 = vmor %vm335_vm4, %vm336_vm1 }
  0xa6   : > { %v332_v48 = vsub.f32 1.0, %v331_v45 }
  0xa7   : > { %v318_v49 = vmul.f32 %v1298_v42, %v317_v46 }
  0xa8   : > { %v333_v52 = vmul.f32 %v1300_v43, %v332_v48 }
  0xa9   : > { %v319_v54 = vadd.f32 %v1298_v42, %v318_v49 }
  0xaa   : > { %v334_v57 = vadd.f32 %v1300_v43, %v333_v52 }
  0xab   : > { %v323_v58 = vsel %vm322_vm3, %v1298_v42, %v319_v54 }
  0xac   : > { %v328_v60 = vsel %vm325_vm5, %v327_v56, %v323_v58  ;;  %v338_v61 = vsel %vm337_vm6, %v1300_v43, %v334_v57 }
  0xad   : > { %v343_v62 = vsel %vm340_vm7, %v342_v59, %v338_v61  ;;  %v349_v63 = vmul.f32 %v347_v55, %v328_v60 }
  0xae   : > { %v350_v0 = vmul.f32 %v347_v55, %v343_v62 }
  0xaf   : > { %v352_v1 = vsel %vm351_vm8, %v349_v63, -inf  ;;  %v405_v2 = vmul.f32 0.5, %v349_v63  ;;  %vm397_vm14 = vcmp.gt.f32.partialorder %v349_v63, 0.25 }
  0xb0   : > { %v359_v3 = vsel %vm351_vm8, %v350_v0, -inf  ;;  %v406_v4 = vmul.f32 0.5, %v350_v0  ;;  %v353_v5 = vrot.slane %v352_v1, 4  ;;  %vm398_vm0 = vcmp.gt.f32.partialorder %v350_v0, 0.25 }
  0xb1   : > { %v360_v6 = vrot.slane %v359_v3, 4  ;;  %v409_v8 = vrot.slane %v405_v2, 2 }
  0xb2   : > { %v410_v9 = vrot.slane %v406_v4, 2  ;;  %v354_v10 = vmax.f32 %v352_v1, %v353_v5 }
  0xb3   : > { %v361_v11 = vmax.f32 %v359_v3, %v360_v6  ;;  %v1480_v12 = vadd.f32 %v409_v8, %v349_v63  ;;  %v1489_v20 = vsub.f32 %v349_v63, %v409_v8 }
  0xb4   : > { %v1482_v13 = vadd.f32 %v410_v9, %v350_v0  ;;  %v355_v14 = vrot.slane %v354_v10, 2  ;;  %v1486_v18 = vsub.f32 %v350_v0, %v410_v9 }
  0xb5   : > { %v362_v15 = vrot.slane %v361_v11, 2  ;;  %v419_v17 = vrot.slane %v1480_v12, 6 }
  0xb6   : > { %v420_v19 = vrot.slane %v1482_v13, 6  ;;  %v356_v21 = vmax.f32 %v354_v10, %v355_v14 }
  0xb7   : > { %v363_v22 = vmax.f32 %v361_v11, %v362_v15  ;;  %v425_v24 = vsel %vm424_vm9, %v1489_v20, %v419_v17 }
  0xb8   : > { %v426_v23 = vsel %vm424_vm9, %v1486_v18, %v420_v19  ;;  %v357_v25 = vrot.slane %v356_v21, 1  ;;  %v428_v32 = vsel %vm427_vm10, %v425_v24, %v419_v17 }
  0xb9   : > { %v364_v26 = vrot.slane %v363_v22, 1  ;;  %v429_v28 = vsel %vm427_vm10, %v426_v23, %v420_v19 }
  0xba   : > { %v432_v29 = vrot.slane %v429_v28, 4  ;;  %v358_v30 = vmax.f32 %v356_v21, %v357_v25 }
  0xbb   : > { %v365_v31 = vmax.f32 %v363_v22, %v364_v26 }
  0xbc   : > { %v434_v33 = vsel %vm433_vm11, %v428_v32, %v432_v29  ;;  %vm368_vm12 = vcmp.eq.f32.partialorder %v349_v63, %v358_v30  ;;  %v395_v34 = vmul.f32 %v358_v30, %v349_v63 }
  0xbd   : > { %vm369_vm13 = vcmp.eq.f32.partialorder %v350_v0, %v365_v31  ;;  %v396_v35 = vmul.f32 %v365_v31, %v350_v0  ;;  %436 = vst [vmem:[%s243_s7] sm:$0xff] %v434_v33  ;;  %v371_v36 = vsel %vm368_vm12, %v370_v27, 3 }
  0xbe   : > { %v372_v37 = vsel %vm369_vm13, %v370_v27, 3  ;;  %v373_v38 = vsel %vm351_vm8, %v371_v36, 2147483647  ;;  %vm399_vm15 = vcmp.gt.f32.partialorder %v395_v34, 0.25 }
  0xbf   : > { %v383_v39 = vsel %vm351_vm8, %v372_v37, 2147483647  ;;  %vm400_vm1 = vcmp.gt.f32.partialorder %v396_v35, 0.25  ;;  %v374_v40 = vrot.slane %v373_v38, 4  ;;  %vm401_vm2 = vmand %vm397_vm14, %vm399_vm15  ;;  %vm1516_vm8 = vcmp.lt.s32.totalorder %v366_v7, 256 }
  0xc0   : > { %v384_v41 = vrot.slane %v383_v39, 4  ;;  %vm402_vm3 = vmand %vm398_vm0, %vm400_vm1  ;;  %v1505_v42 = vsel %vm401_vm2, %v395_v34, 0.0  ;;  %vm423_vm14 = vcmask 1040384  }
  0xc1   : > { %v1507_v43 = vsel %vm402_vm3, %v396_v35, 0.0  ;;  %vm375_vm4 = vcmp.lt.s32.totalorder %v373_v38, %v374_v40  ;;  %439 = vst [vmem:[#allocation1] sm:$0xff] %v1505_v42 }
  0xc2   : > { %vm385_vm5 = vcmp.lt.s32.totalorder %v383_v39, %v384_v41  ;;  %440 = vst [vmem:[#allocation1 + $0x9] sm:$0xff] %v1507_v43  ;;  %v376_v44 = vsel %vm375_vm4, %v373_v38, %v374_v40 }
  0xc3   : > { %v386_v45 = vsel %vm385_vm5, %v383_v39, %v384_v41  ;;  %v377_v46 = vrot.slane %v376_v44, 2 }
  0xc4   : > { %v387_v47 = vrot.slane %v386_v45, 2 }
  0xc5   : > { %vm378_vm6 = vcmp.lt.s32.totalorder %v376_v44, %v377_v46 }
  0xc6   : > { %vm388_vm7 = vcmp.lt.s32.totalorder %v386_v45, %v387_v47  ;;  %v379_v48 = vsel %vm378_vm6, %v376_v44, %v377_v46 }
  0xc7   : > { %v389_v49 = vsel %vm388_vm7, %v386_v45, %v387_v47  ;;  %v380_v50 = vrot.slane %v379_v48, 1 }
  0xc8   : > { %v390_v52 = vrot.slane %v389_v49, 1 }
  0xc9   : > { %vm381_vm12 = vcmp.lt.s32.totalorder %v379_v48, %v380_v50  ;;  %v442_v53 = vld [vmem:[#allocation1 + $0x4] ss:$9 sm:$0xff] }
  0xca   : > { %vm391_vm13 = vcmp.lt.s32.totalorder %v389_v49, %v390_v52  ;;  %v382_v54 = vsel %vm381_vm12, %v379_v48, %v380_v50  ;;  %448 = vst.msk [vmem:[%s247_s10] sm:$0x3] %vm1516_vm8, %v442_v53 }
  0xcb   : > { %v392_v55 = vsel %vm391_vm13, %v389_v49, %v390_v52  ;;  %v393_v56 = vcvt.s32.f32 %v382_v54 }
  0xcc   : > { %v394_v57 = vcvt.s32.f32 %v392_v55 }
  0xcd   : > { %v455_v58 = vmul.f32 4096.0, %v393_v56 }
  0xce   : > { %v456_v59 = vmul.f32 4096.0, %v394_v57  ;;  %v451_v60 = vrot.slane %v394_v57, 7 }
  0xcf   : > { %v459_v61 = vadd.f32 %v455_v58, %v1480_v12  ;;  %v457_v0 = vadd.f32 %v455_v58, %v1489_v20 }
  0xd0   : > { %v460_v62 = vadd.f32 %v456_v59, %v1482_v13  ;;  %v452_v63 = vsel %vm423_vm14, %v393_v56, %v451_v60  ;;  %v458_v2 = vadd.f32 %v456_v59, %v1486_v18 }
  0xd1   : > { %v463_v1 = vrot.slane %v459_v61, 6  ;;  %454 = vst.msk [vmem:[%s251_s13] sm:$0x3] %vm1516_vm8, %v452_v63 }
  0xd2   : > { %v464_v3 = vrot.slane %v460_v62, 6 }
  0xd3   : > { %v467_v4 = vsel %vm424_vm9, %v457_v0, %v463_v1 }
  0xd4   : > { %v468_v5 = vsel %vm424_vm9, %v458_v2, %v464_v3  ;;  %v1536_v6 = vsel %vm427_vm10, %v467_v4, %v463_v1  ;;  %vm543_vm9 = vcmask 64512  }
  0xd5   : > { %v1539_v8 = vsel %vm427_vm10, %v468_v5, %v464_v3  ;;  %v473_v9 = vrot.slane %v1536_v6, 4  ;;  %v576_v10 = vrot.slane %v1536_v6, 6 }
  0xd6   : > { %v474_v11 = vrot.slane %v1539_v8, 4  ;;  %v577_v12 = vrot.slane %v1539_v8, 6 }
  0xd7   : > { %v477_v13 = vsel %vm433_vm11, %v1536_v6, %v473_v9  ;;  %v580_v14 = vsub.f32 %v1536_v6, %v576_v10 }
  0xd8   : > { %v478_v15 = vsel %vm433_vm11, %v1539_v8, %v474_v11  ;;  %v581_v16 = vsub.f32 %v1539_v8, %v577_v12  ;;  %479 = vxpose.xlu2.b32.start.end [1/1] (short) %v477_v13, 128 }
  0xd9   : > { %511 = vxpose.xlu1.b32.start.end [1/1] (short) %v478_v15, 128  ;;  %v584_v17 = vrot.slane %v580_v14, 1 }
  0xda   : > { %v585_v18 = vrot.slane %v581_v16, 1 }
  0xdb   : > { %v1551_v19 = vmul.f32 %v584_v17, %v580_v14 }
  0xdc   : > { %v1553_v20 = vmul.f32 %v585_v18, %v581_v16 }
 0x171   : > { %v495_v21 = vpop.trf.xlu2 }
 0x172   : > { %544 = vst.msk [vmem:[#allocation3] sm:$0xff] %vm543_vm9, %v495_v21 }
 0x179   : > { %v496_v22 = vpop.trf.xlu2 }
 0x17a   : > { %545 = vst.msk [vmem:[#allocation3 + $0x8] sm:$0xff] %vm543_vm9, %v496_v22 }
 0x17d   : > { %v527_v23 = vpop.trf.xlu1 }
 0x17e   : > { %560 = vst.msk [vmem:[#allocation3 + $0x80] sm:$0xff] %vm543_vm9, %v527_v23 }
 0x181   : > { %v497_v24 = vpop.trf.xlu2 }
 0x182   : > { %546 = vst.msk [vmem:[#allocation3 + $0x10] sm:$0xff] %vm543_vm9, %v497_v24 }
 0x185   : > { %v528_v25 = vpop.trf.xlu1 }
 0x186   : > { %561 = vst.msk [vmem:[#allocation3 + $0x88] sm:$0xff] %vm543_vm9, %v528_v25 }
 0x189   : > { %v498_v26 = vpop.trf.xlu2 }
 0x18a   : > { %547 = vst.msk [vmem:[#allocation3 + $0x18] sm:$0xff] %vm543_vm9, %v498_v26 }
 0x18d   : > { %v529_v27 = vpop.trf.xlu1 }
 0x18e   : > { %562 = vst.msk [vmem:[#allocation3 + $0x90] sm:$0xff] %vm543_vm9, %v529_v27 }
 0x191   : > { %v499_v28 = vpop.trf.xlu2 }
 0x192   : > { %548 = vst.msk [vmem:[#allocation3 + $0x20] sm:$0xff] %vm543_vm9, %v499_v28 }
 0x195   : > { %v530_v29 = vpop.trf.xlu1 }
 0x196   : > { %563 = vst.msk [vmem:[#allocation3 + $0x98] sm:$0xff] %vm543_vm9, %v530_v29 }
 0x199   : > { %v500_v30 = vpop.trf.xlu2 }
 0x19a   : > { %549 = vst.msk [vmem:[#allocation3 + $0x28] sm:$0xff] %vm543_vm9, %v500_v30 }
 0x19d   : > { %v531_v31 = vpop.trf.xlu1 }
 0x19e   : > { %564 = vst.msk [vmem:[#allocation3 + $0xa0] sm:$0xff] %vm543_vm9, %v531_v31 }
 0x1a1   : > { %v501_v32 = vpop.trf.xlu2 }
 0x1a2   : > { %550 = vst.msk [vmem:[#allocation3 + $0x30] sm:$0xff] %vm543_vm9, %v501_v32 }
 0x1a5   : > { %v532_v33 = vpop.trf.xlu1 }
 0x1a6   : > { %565 = vst.msk [vmem:[#allocation3 + $0xa8] sm:$0xff] %vm543_vm9, %v532_v33 }
 0x1a9   : > { %v502_v34 = vpop.trf.xlu2 }
 0x1aa   : > { %551 = vst.msk [vmem:[#allocation3 + $0x38] sm:$0xff] %vm543_vm9, %v502_v34 }
 0x1ad   : > { %v533_v35 = vpop.trf.xlu1 }
 0x1ae   : > { %566 = vst.msk [vmem:[#allocation3 + $0xb0] sm:$0xff] %vm543_vm9, %v533_v35 }
 0x1b1   : > { %v503_v36 = vpop.trf.xlu2 }
 0x1b2   : > { %552 = vst.msk [vmem:[#allocation3 + $0x40] sm:$0xff] %vm543_vm9, %v503_v36 }
 0x1b5   : > { %v534_v37 = vpop.trf.xlu1 }
 0x1b6   : > { %567 = vst.msk [vmem:[#allocation3 + $0xb8] sm:$0xff] %vm543_vm9, %v534_v37 }
 0x1b9   : > { %v504_v38 = vpop.trf.xlu2 }
 0x1ba   : > { %553 = vst.msk [vmem:[#allocation3 + $0x48] sm:$0xff] %vm543_vm9, %v504_v38 }
 0x1bd   : > { %v535_v39 = vpop.trf.xlu1 }
 0x1be   : > { %568 = vst.msk [vmem:[#allocation3 + $0xc0] sm:$0xff] %vm543_vm9, %v535_v39 }
 0x1c1   : > { %v505_v40 = vpop.trf.xlu2 }
 0x1c2   : > { %554 = vst.msk [vmem:[#allocation3 + $0x50] sm:$0xff] %vm543_vm9, %v505_v40 }
 0x1c5   : > { %v536_v41 = vpop.trf.xlu1 }
 0x1c6   : > { %569 = vst.msk [vmem:[#allocation3 + $0xc8] sm:$0xff] %vm543_vm9, %v536_v41 }
 0x1c9   : > { %v506_v44 = vpop.trf.xlu2 }
 0x1ca   : > { %555 = vst.msk [vmem:[#allocation3 + $0x58] sm:$0xff] %vm543_vm9, %v506_v44 }
 0x1cd   : > { %v537_v45 = vpop.trf.xlu1 }
 0x1ce   : > { %570 = vst.msk [vmem:[#allocation3 + $0xd0] sm:$0xff] %vm543_vm9, %v537_v45 }
 0x1d1   : > { %v507_v46 = vpop.trf.xlu2 }
 0x1d2   : > { %556 = vst.msk [vmem:[#allocation3 + $0x60] sm:$0xff] %vm543_vm9, %v507_v46 }
 0x1d5   : > { %v538_v47 = vpop.trf.xlu1 }
 0x1d6   : > { %571 = vst.msk [vmem:[#allocation3 + $0xd8] sm:$0xff] %vm543_vm9, %v538_v47 }
 0x1d9   : > { %v508_v48 = vpop.trf.xlu2 }
 0x1da   : > { %557 = vst.msk [vmem:[#allocation3 + $0x68] sm:$0xff] %vm543_vm9, %v508_v48 }
 0x1dd   : > { %v539_v49 = vpop.trf.xlu1 }
 0x1de   : > { %572 = vst.msk [vmem:[#allocation3 + $0xe0] sm:$0xff] %vm543_vm9, %v539_v49 }
 0x1e1   : > { %v509_v50 = vpop.trf.xlu2 }
 0x1e2   : > { %558 = vst.msk [vmem:[#allocation3 + $0x70] sm:$0xff] %vm543_vm9, %v509_v50 }
 0x1e5   : > { %v540_v52 = vpop.trf.xlu1 }
 0x1e6   : > { %573 = vst.msk [vmem:[#allocation3 + $0xe8] sm:$0xff] %vm543_vm9, %v540_v52 }
 0x1e9   : > { %v510_v53 = vpop.trf.xlu2 }
 0x1ea   : > { %559 = vst.msk [vmem:[#allocation3 + $0x78] sm:$0xff] %vm543_vm9, %v510_v53 }
 0x1ed   : > { %v541_v54 = vpop.trf.xlu1 }
 0x1ee   : > { %574 = vst.msk [vmem:[#allocation3 + $0xf0] sm:$0xff] %vm543_vm9, %v541_v54 }
 0x1f5   : > { %v542_v55 = vpop.trf.xlu1 }
 0x1f6   : > { %575 = vst.msk [vmem:[#allocation3 + $0xf8] sm:$0xff] %vm543_vm9, %v542_v55 }
 0x1f7 LB: >> { %v1415_v56 = vmov 0   ;;  %s1177_s15 = sshll.u32 %s1376_s14, 5  ;;  %s1416_s17 = smov 2   ;;  %v1417_v61 = vmov 3   ;;  %v1418_v62 = vmov 2   ;;  %v1419_v63 = vmov 1   ;;  %s1376_s14 = sphi %s1587_s14, %s595_s14  }
 0x1f8   : >> { %1303 = vset.pattern.permute.xlu0 %v1415_v56  ;;  %1302 = vset.pattern.permute.xlu2 %v1415_v56  ;;  %s597_s16 = scalar_lea.vmem [#allocation3], %s1177_s15  ;;  %s1420_s19 = smov 127   ;;  %v1606_v28 = vperm.slane %v1536_v6, 0  ;;  %v1609_v29 = vperm.slane %v1539_v8, 0  ;;  %v1612_v30 = vperm.slane %v1536_v6, 3  ;;  %v1615_v31 = vperm.slane %v1539_v8, 3 }
 0x1f9   : >> { %1301 = vset.pattern.permute.xlu1 %v1418_v62  ;;  %v1618_v32 = vperm.slane %v1536_v6, 1  ;;  %v1621_v33 = vperm.slane %v1539_v8, 1  ;;  %v1625_v35 = vperm.slane %v1536_v6, 2  ;;  %v1628_v36 = vperm.slane %v1539_v8, 2  ;;  %s848_s20 = sshra.s32 %s1177_s15, 3  ;;  %s595_s14 = sadd.s32 1, %s1376_s14  }
 0x1fa   : >> { %s1187_s21 = sshll.u32 %s848_s20, 4  ;;  %p592_p4 = scmp.ge.s32.totalorder %s595_s14, 8  }
 0x1fb   : >> { %s1677_s23 = scalar_lea.vmem [#allocation2], %s1187_s21  ;;  %vm864_vm10 = vcmp.gt.f32.partialorder (%p592_p4), %v1505_v42, 0.0  ;;  %vm874_vm11 = vcmask (%p592_p4), 1044484   ;;  %vm865_vm15 = vcmp.gt.f32.partialorder (%p592_p4), %v1507_v43, 0.0 }
 0x1fd   : >> { %v600_v57 = vld [vmem:[%s597_s16 + $0x10] sm:$0xff]  ;;  %v598_v58 = vld [vmem:[%s597_s16] sm:$0xff]  ;;  %v599_v59 = vld [vmem:[%s597_s16 + $0x8] sm:$0xff] }
 0x1fe   : >> { %754 = vrot.lane.b32.xlu2 %v600_v57, %s1416_s17  ;;  %750 = vrot.lane.b32.xlu1 %v598_v58, %s1416_s17  ;;  %v601_v60 = vld [vmem:[%s597_s16 + $0x18] sm:$0xff] }
 0x1ff   : >> { %637 = vperm.xlu0 %1303, %v599_v59  }
 0x206   : >> { %756 = vrot.lane.b32.xlu2 %v601_v60, %s1416_s17  ;;  %752 = vrot.lane.b32.xlu1 %v599_v59, %s1416_s17 }
 0x207   : >> { %1306 = vset.pattern.permute.xlu0 %v1417_v61 }
 0x208   : >> { %679 = vperm.xlu0 %1306, %v599_v59  }
 0x20e   : >> { %633 = vperm.xlu2 %1302, %v598_v58   ;;  %619 = vperm.xlu1 %1301, %v601_v60  }
 0x210   : >> { %1310 = vset.pattern.permute.xlu0 %v1419_v63 }
 0x216   : >> { %1305 = vset.pattern.permute.xlu2 %v1417_v61  ;;  %1304 = vset.pattern.permute.xlu1 %v1415_v56 }
 0x217   : >> { %641 = vperm.xlu1 %1304, %v600_v57  }
 0x258   : >> { %v755_v0 = vpop.permute.xlu2 %754 }
 0x259   : >> { %v764_v9 = vsub.f32 %v600_v57, %v755_v0 }
 0x260   : >> { %v757_v1 = vpop.permute.xlu2 %756 }
 0x261   : >> { %v765_v2 = vsub.f32 %v601_v60, %v757_v1 }
 0x263   : >> { %776 = vrot.lane.b32.xlu0 %v765_v2, %s1420_s19 }
 0x268   : >> { %v1595_v12 = vpop.permute.xlu2 %633 }
 0x26b   : >> { %709 = vperm.xlu0 %1310, %v600_v57  }
 0x270   : >> { %v751_v3 = vpop.permute.xlu1 %750 }
 0x271   : >> { %v762_v4 = vsub.f32 %v598_v58, %v751_v3  ;;  %v638_v11 = vpop.permute.xlu0 %637 }
 0x272   : >> { %v652_v34 = vmax.f32 %v638_v11, %v1606_v28  ;;  %v653_v38 = vmax.f32 %v638_v11, %v1609_v29 }
 0x273   : >> { %1311 = vset.pattern.permute.xlu0 %v1418_v62  ;;  %770 = vrot.lane.b32.xlu2 %v762_v4, %s1420_s19 }
 0x274   : >> { %604 = vperm.xlu0 %1311, %v598_v58  }
 0x278   : >> { %v753_v5 = vpop.permute.xlu1 %752 }
 0x279   : >> { %v763_v10 = vsub.f32 %v599_v59, %v753_v5  ;;  %v651_v5 = vmax.f32 %v1595_v12, %v1609_v29 }
 0x27a   : >> { %v680_v13 = vpop.permute.xlu0 %679 }
 0x27b   : >> { %774 = vrot.lane.b32.xlu2 %v764_v9, %s1420_s19  ;;  %772 = vrot.lane.b32.xlu1 %v763_v10, %s1420_s19  ;;  %v694_v39 = vmin.f32 %v680_v13, %v1612_v30  ;;  %v695_v40 = vmin.f32 %v680_v13, %v1615_v31 }
 0x27c   : >> { %609 = vperm.xlu0 %1311, %v599_v59  }
 0x280   : >> { %v1597_v22 = vpop.permute.xlu1 %619 }
 0x283   : >> { %675 = vperm.xlu2 %1305, %v598_v58   ;;  %645 = vperm.xlu1 %1304, %v601_v60  }
 0x284   : >> { %614 = vperm.xlu0 %1311, %v600_v57  }
 0x289   : >> { %v1601_v25 = vpop.permute.xlu1 %641 }
 0x28b   : >> { %687 = vperm.xlu2 %1305, %v601_v60   ;;  %1307 = vset.pattern.permute.xlu1 %v1417_v61 }
 0x28c   : >> { %683 = vperm.xlu1 %1307, %v600_v57  }
 0x293   : >> { %1309 = vset.pattern.permute.xlu2 %v1419_v63 }
 0x294   : >> { %705 = vperm.xlu2 %1309, %v599_v59   ;;  %1308 = vset.pattern.permute.xlu1 %v1419_v63 }
 0x295   : >> { %701 = vperm.xlu1 %1308, %v598_v58  }
 0x29c   : >> { %1312 = vset.pattern.permute.xlu2 %v1418_v62 }
 0x29d   : >> { %713 = vperm.xlu1 %1308, %v601_v60  }
 0x2a5   : >> { %1313 = vset.pattern.permute.xlu1 %v1418_v62 }
 0x2cd   : >> { %v771_v14 = vpop.permute.xlu2 %770 }
 0x2ce   : >> { %v782_v15 = vmul.f32 %v771_v14, %v762_v4  ;;  %v650_v4 = vmax.f32 %v1595_v12, %v1606_v28 }
 0x2d0   : >> { %788 = vperm.xlu2 %1312, %v782_v15  }
 0x2d5   : >> { %v777_v16 = vpop.permute.xlu0 %776  ;;  %v775_v17 = vpop.permute.xlu2 %774 }
 0x2d6   : >> { %v785_v18 = vmul.f32 %v777_v16, %v765_v2  ;;  %v784_v21 = vmul.f32 %v775_v17, %v764_v9 }
 0x2d8   : >> { %803 = vperm.xlu0 %1311, %v785_v18   ;;  %798 = vperm.xlu2 %1312, %v784_v21  }
 0x2dd   : >> { %v1599_v23 = vpop.permute.xlu0 %709  ;;  %v676_v24 = vpop.permute.xlu2 %675 }
 0x2de   : >> { %v692_v0 = vmin.f32 %v676_v24, %v1612_v30  ;;  %v693_v1 = vmin.f32 %v676_v24, %v1615_v31  ;;  %v722_v16 = vmax.f32 %v1599_v23, %v1618_v32  ;;  %v723_v17 = vmax.f32 %v1599_v23, %v1621_v33 }
 0x2df   : >> { %v654_v23 = vmax.f32 %v1601_v25, %v1606_v28 }
 0x2e5   : >> { %v1603_v26 = vpop.permute.xlu2 %687 }
 0x2e6   : >> { %v605_v27 = vpop.permute.xlu0 %604 }
 0x2e7   : >> { %v624_v9 = vmin.f32 %v605_v27, %v1625_v35 }
 0x2e9   : >> { %v658_v14 = vsub.f32 %v624_v9, %v650_v4 }
 0x2ed   : >> { %v773_v37 = vpop.permute.xlu1 %772 }
 0x2ee   : >> { %v783_v41 = vmul.f32 %v773_v37, %v763_v10  ;;  %v610_v44 = vpop.permute.xlu0 %609  ;;  %v706_v45 = vpop.permute.xlu2 %705  ;;  %v625_v10 = vmin.f32 %v605_v27, %v1628_v36  ;;  %v1660_v37 = vperm.slane %v1551_v19, 2  ;;  %v1663_v27 = vperm.slane %v1553_v20, 2 }
 0x2ef   : >> { %v626_v46 = vmin.f32 %v610_v44, %v1625_v35  ;;  %v627_v47 = vmin.f32 %v610_v44, %v1628_v36  ;;  %v720_v48 = vmax.f32 %v706_v45, %v1618_v32  ;;  %v721_v49 = vmax.f32 %v706_v45, %v1621_v33 }
 0x2f0   : >> { %793 = vperm.xlu1 %1313, %v783_v41   ;;  %v659_v15 = vsub.f32 %v625_v10, %v651_v5  ;;  %v655_v44 = vmax.f32 %v1601_v25, %v1609_v29 }
 0x2f1   : >> { %v660_v50 = vsub.f32 %v626_v46, %v652_v34  ;;  %v661_v52 = vsub.f32 %v627_v47, %v653_v38  ;;  %v728_v53 = vsub.f32 %v694_v39, %v720_v48  ;;  %v729_v54 = vsub.f32 %v695_v40, %v721_v49 }
 0x2f2   : >> { %v666_v38 = vmax.f32 %v658_v14, 0.0  ;;  %v667_v39 = vmax.f32 %v659_v15, 0.0 }
 0x2f3   : >> { %v668_v55 = vmax.f32 %v660_v50, 0.0  ;;  %v669_v56 = vmax.f32 %v661_v52, 0.0  ;;  %v736_v57 = vmax.f32 %v728_v53, 0.0  ;;  %v737_v58 = vmax.f32 %v729_v54, 0.0 }
 0x2f5   : >> { %v1637_v59 = vmul.f32 %v736_v57, %v668_v55  ;;  %v1639_v60 = vmul.f32 %v737_v58, %v669_v56  ;;  %v1641_v61 = vpop.permute.xlu1 %645 }
 0x2f6   : >> { %v615_v18 = vpop.permute.xlu0 %614 }
 0x2f7   : >> { %v628_v40 = vmin.f32 %v615_v18, %v1625_v35  ;;  %v629_v41 = vmin.f32 %v615_v18, %v1628_v36 }
 0x2f9   : >> { %v662_v53 = vsub.f32 %v628_v40, %v654_v23  ;;  %v663_v54 = vsub.f32 %v629_v41, %v655_v44  ;;  %v656_v41 = vmax.f32 %v1641_v61, %v1606_v28  ;;  %v657_v23 = vmax.f32 %v1641_v61, %v1609_v29 }
 0x2fb   : >> { %v670_v25 = vmax.f32 %v662_v53, 0.0 }
 0x2fe   : >> { %v684_v62 = vpop.permute.xlu1 %683 }
 0x2ff   : >> { %v696_v21 = vmin.f32 %v684_v62, %v1612_v30  ;;  %v697_v24 = vmin.f32 %v684_v62, %v1615_v31 }
 0x301   : >> { %v730_v45 = vsub.f32 %v696_v21, %v722_v16  ;;  %v731_v46 = vsub.f32 %v697_v24, %v723_v17  ;;  %v698_v24 = vmin.f32 %v1603_v26, %v1612_v30  ;;  %v630_v30 = vmin.f32 %v1597_v22, %v1625_v35 }
 0x303   : >> { %v738_v57 = vmax.f32 %v730_v45, 0.0  ;;  %v739_v58 = vmax.f32 %v731_v46, 0.0 }
 0x307   : >> { %v702_v63 = vpop.permute.xlu1 %701 }
 0x308   : >> { %v718_v2 = vmax.f32 %v702_v63, %v1618_v32  ;;  %v719_v3 = vmax.f32 %v702_v63, %v1621_v33 }
 0x30a   : >> { %v726_v11 = vsub.f32 %v692_v0, %v718_v2  ;;  %v727_v13 = vsub.f32 %v693_v1, %v719_v3  ;;  %v671_v0 = vmax.f32 %v663_v54, 0.0  ;;  %v746_v2 = vmul.f32 %v738_v57, %v670_v25 }
 0x30c   : >> { %v734_v12 = vmax.f32 %v726_v11, 0.0  ;;  %v735_v34 = vmax.f32 %v727_v13, 0.0  ;;  %v747_v3 = vmul.f32 %v739_v58, %v671_v0 }
 0x30e   : >> { %v742_v48 = vmul.f32 %v734_v12, %v666_v38  ;;  %v743_v49 = vmul.f32 %v735_v34, %v667_v39  ;;  %v699_v12 = vmin.f32 %v1603_v26, %v1615_v31  ;;  %v631_v26 = vmin.f32 %v1597_v22, %v1628_v36 }
 0x30f   : >> { %v714_v18 = vpop.permute.xlu1 %713 }
 0x310   : >> { %v724_v34 = vmax.f32 %v714_v18, %v1618_v32  ;;  %v725_v38 = vmax.f32 %v714_v18, %v1621_v33  ;;  %v664_v33 = vsub.f32 %v630_v30, %v656_v41  ;;  %v665_v45 = vsub.f32 %v631_v26, %v657_v23 }
 0x312   : >> { %v732_v31 = vsub.f32 %v698_v24, %v724_v34  ;;  %v733_v32 = vsub.f32 %v699_v12, %v725_v38  ;;  %v673_v28 = vmax.f32 %v665_v45, 0.0 }
 0x314   : >> { %v740_v46 = vmax.f32 %v732_v31, 0.0 }
 0x32a   : >> { %v789_v47 = vpop.permute.xlu2 %788 }
 0x32b   : >> { %v808_v50 = vadd.f32 %v1660_v37, %v789_v47  ;;  %v809_v52 = vadd.f32 %v1663_v27, %v789_v47  ;;  %v741_v47 = vmax.f32 %v733_v32, 0.0  ;;  %v1724_v32 = vmov (%p592_p4), 4294967295  }
 0x32d   : >> { %v816_v55 = vsub.f32 %v808_v50, %v742_v48  ;;  %v817_v56 = vsub.f32 %v809_v52, %v743_v49  ;;  %v749_v61 = vmul.f32 %v741_v47, %v673_v28 }
 0x32f   : >> { %v824_v62 = vadd.f32 1e-09, %v816_v55  ;;  %v825_v63 = vadd.f32 1e-09, %v817_v56 }
 0x331   : >> { %1314 = vrcp.f32 %v824_v62 }
 0x332   : >> { %1316 = vrcp.f32 %v825_v63  ;;  %v799_v1 = vpop.permute.xlu2 %798 }
 0x333   : >> { %v812_v4 = vadd.f32 %v1660_v37, %v799_v1  ;;  %v813_v5 = vadd.f32 %v1663_v27, %v799_v1 }
 0x335   : >> { %v820_v9 = vsub.f32 %v812_v4, %v746_v2  ;;  %v821_v10 = vsub.f32 %v813_v5, %v747_v3 }
 0x337   : >> { %v1315_v11 = vpop.eup %1314  ;;  %v828_v13 = vadd.f32 1e-09, %v820_v9  ;;  %v829_v14 = vadd.f32 1e-09, %v821_v10 }
 0x338   : >> { %v1317_v15 = vpop.eup %1316  ;;  %v840_v16 = vmul.f32 %v1315_v11, %v742_v48  ;;  %v672_v48 = vmax.f32 %v664_v33, 0.0  ;;  %v1726_v33 = vmov (%p592_p4), 4294967295  }
 0x339   : >> { %v841_v17 = vmul.f32 %v1317_v15, %v743_v49  ;;  %1318 = vrcp.f32 %v828_v13 }
 0x33a   : >> { %853 = vst [vmem:[%s1677_s23] sm:$0xff] %v840_v16  ;;  %1320 = vrcp.f32 %v829_v14  ;;  %v748_v29 = vmul.f32 %v740_v46, %v672_v48 }
 0x33b   : >> { %854 = vst [vmem:[%s1677_s23 + $0x8] sm:$0xff] %v841_v17 }
 0x33f   : >> { %v1319_v21 = vpop.eup %1318 }
 0x340   : >> { %v1321_v39 = vpop.eup %1320  ;;  %v844_v40 = vmul.f32 %v1319_v21, %v746_v2 }
 0x341   : >> { %v845_v44 = vmul.f32 %v1321_v39, %v747_v3 }
 0x342   : >> { %857 = vst [vmem:[%s1677_s23 + $0x20] sm:$0xff] %v844_v40 }
 0x343   : >> { %858 = vst [vmem:[%s1677_s23 + $0x28] sm:$0xff] %v845_v44 }
 0x34a   : >> { %v804_v49 = vpop.permute.xlu0 %803 }
 0x34b   : >> { %v814_v50 = vadd.f32 %v1660_v37, %v804_v49  ;;  %v815_v35 = vadd.f32 %v1663_v27, %v804_v49 }
 0x34d   : >> { %v822_v52 = vsub.f32 %v814_v50, %v748_v29  ;;  %v823_v22 = vsub.f32 %v815_v35, %v749_v61 }
 0x34f   : >> { %v830_v36 = vadd.f32 1e-09, %v822_v52  ;;  %v831_v53 = vadd.f32 1e-09, %v823_v22 }
 0x351   : >> { %1322 = vrcp.f32 %v830_v36 }
 0x352   : >> { %1324 = vrcp.f32 %v831_v53 }
 0x357   : >> { %v1323_v54 = vpop.eup %1322 }
 0x358   : >> { %v1325_v55 = vpop.eup %1324  ;;  %v846_v56 = vmul.f32 %v1323_v54, %v748_v29 }
 0x359   : >> { %v847_v57 = vmul.f32 %v1325_v55, %v749_v61 }
 0x35a   : >> { %859 = vst [vmem:[%s1677_s23 + $0x30] sm:$0xff] %v846_v56 }
 0x35b   : >> { %860 = vst [vmem:[%s1677_s23 + $0x38] sm:$0xff] %v847_v57 }
 0x362   : >> { %v794_v58 = vpop.permute.xlu1 %793 }
 0x363   : >> { %v810_v62 = vadd.f32 %v1660_v37, %v794_v58  ;;  %v811_v63 = vadd.f32 %v1663_v27, %v794_v58  ;;  %v1713_v37 = vand.u32 (%p592_p4), 127, %v366_v7  ;;  %v866_v27 = vand.u32 (%p592_p4), 4294967040, %v1505_v42 }
 0x365   : >> { %v818_v25 = vsub.f32 %v810_v62, %v1637_v59  ;;  %v819_v0 = vsub.f32 %v811_v63, %v1639_v60  ;;  %v1717_v10 = vadd.s32 (%p592_p4), 128, %v1713_v37 }
 0x367   : >> { %v826_v1 = vadd.f32 1e-09, %v818_v25  ;;  %v827_v2 = vadd.f32 1e-09, %v819_v0  ;;  %v869_v11 = vsub.s32 (%p592_p4), 255, %v1717_v10 }
 0x369   : >> { %1326 = vrcp.f32 %v826_v1 }
 0x36a   : >> { %1328 = vrcp.f32 %v827_v2 }
 0x36f   : >> { %v1327_v3 = vpop.eup %1326  ;;  %594 = sbr.rel (!%p592_p4) target bundleno = 503 (0x1f7), region = 112 }
 0x370   : >> { %v1329_v4 = vpop.eup %1328  ;;  %v842_v5 = vmul.f32 %v1327_v3, %v1637_v59  ;;  %v867_v59 = vand.u32 (%p592_p4), 4294967040, %v1507_v43 }
 0x371   : >> { %v843_v9 = vmul.f32 %v1329_v4, %v1639_v60  ;;  %v868_v60 = vsub.s32 (%p592_p4), 255, %v1713_v37 }
 0x372   : >> { %855 = vst [vmem:[%s1677_s23 + $0x10] sm:$0xff] %v842_v5  ;;  %v871_v6 = vor.u32 (%p592_p4), %v869_v11, %v867_v59 }
 0x373   : >> { %856 = vst [vmem:[%s1677_s23 + $0x18] sm:$0xff] %v843_v9  ;;  %v870_v13 = vor.u32 (%p592_p4), %v868_v60, %v866_v27 }
 0x374   : > { %v873_v20 = vsel %vm865_vm15, %v871_v6, 0 }
 0x375   : > { %v872_v7 = vsel %vm864_vm10, %v870_v13, 0  ;;  %v876_v14 = vsel %vm874_vm11, %v873_v20, 2147483648  ;;  %v904_v15 = vrot.slane %v873_v20, 4  }
 0x376   : > { %v875_v8 = vsel %vm874_vm11, %v872_v7, 2147483648  ;;  %v903_v19 = vrot.slane %v872_v7, 4  }
 0x377   : > { %vm877_vm0 = vcmp.gt.s32.totalorder %v875_v8, %v876_v14 }
 0x378   : > { %v878_v16 = vsel %vm877_vm0, %v875_v8, %v876_v14 }
 0x379   : > { %v880_v17 = vshra.s32 %v878_v16, 16  ;;  %v879_v21 = vand.u32 65535, %v878_v16 }
 0x37b   : > { %v882_v18 = vcvt.s32.f32 %v880_v17  ;;  %v881_v42 = vcvt.s32.f32 %v879_v21 }
 0x37d   : > { %883 = vmax.xlane.f32.xlu0 %v882_v18 }
 0x3f0   : > { %v884_v24 = vpop.xlane.xlu0 %883 }
 0x3f1   : > { %vm885_vm1 = vcmp.eq.f32.partialorder %v882_v18, %v884_v24  ;;  %v890_v34 = vcvt.f32.s32 %v884_v24 }
 0x3f2   : > { %v886_v12 = vsel %vm885_vm1, %v881_v42, -inf }
 0x3f3   : > { %887 = vmax.xlane.f32.xlu0 %v886_v12  ;;  %v891_v38 = vshll.u32 %v890_v34, 16 }
 0x466   : > { %v888_v43 = vpop.xlane.xlu0 %887 }
 0x467   : > { %v889_v39 = vcvt.f32.s32 %v888_v43 }
 0x469   : > { %v892_v40 = vadd.s32 %v891_v38, %v889_v39 }
 0x46b   : > { %v893_v41 = vrot.slane %v892_v40, 4 }
 0x46d   : > { %vm894_vm2 = vcmp.gt.s32.totalorder %v892_v40, %v893_v41 }
 0x46e   : > { %v895_v23 = vsel %vm894_vm2, %v892_v40, %v893_v41 }
 0x46f   : > { %v896_v44 = vrot.slane %v895_v23, 2 }
 0x471   : > { %vm897_vm3 = vcmp.gt.s32.totalorder %v895_v23, %v896_v44 }
 0x472   : > { %v898_v30 = vsel %vm897_vm3, %v895_v23, %v896_v44 }
 0x473   : > { %v899_v26 = vrot.slane %v898_v30, 1 }
 0x475   : > { %vm900_vm4 = vcmp.gt.s32.totalorder %v898_v30, %v899_v26 }
 0x476   : > { %v901_v31 = vsel %vm900_vm4, %v898_v30, %v899_v26 }
 0x477   : > { %1190 = vpush %v901_v31 }
 0x4a8   : > { %s1191_s24 = spop %1190  }
 0x4a9   : > { %p1101_p5 = scmp.ge.s32.totalorder %s1191_s24, 256 }
 0x4aa   : > { %v1728_v45 = vmov (%p1101_p5), 4294967295   ;;  %v1730_v46 = vmov (%p1101_p5), 4294967295   ;;  %s1738_s26 = smov (%p1101_p5), 0  }
 0x4ab   : > { %1103 = sbr.rel (!%p1101_p5) target bundleno = 1529 (0x5f9), region = 117 }
 0x4b0 LB: >> { %s918_s27 = sand.u32 255, %s1396_s24  ;;  %v920_v47 = vstv %s1400_s26  ;;  %s977_s28 = sadd.s32 1, %s1400_s26   ;;  %v944_v28 = vrot.slane %v1388_v15, 7  ;;  %v1421_v61 = vmov 0   ;;  %s1400_s26 = sphi %s1738_s26, %s1801_s26   ;;  %s1396_s24 = sphi %s1191_s24, %s1193_s24   ;;  %v1392_v19 = vphi %v903_v19, %v947_v19   ;;  %v1388_v15 = vphi %v904_v15, %v948_v15   ;;  %v1384_v46 = vphi %v1730_v46, %v1800_v46   ;;  %v1380_v45 = vphi %v1728_v45, %v1799_v45  }
 0x4b1   : >> { %s919_s29 = ssub.s32 255, %s918_s27  ;;  %vm921_vm5 = vcmp.eq.s32.totalorder %v1713_v37, %v920_v47  ;;  %vm922_vm6 = vcmp.eq.s32.totalorder %v1717_v10, %v920_v47  ;;  %p912_p6 = scmp.lt.s32.totalorder %s977_s28, 256 }
 0x4b2   : >> { %v923_v48 = vstv %s919_s29  ;;  %s926_s30 = sshra.s32 %s919_s29, 3  ;;  %s929_s6 = sand.u32 7, %s919_s29  ;;  %v945_v53 = vsel %vm423_vm14, %v1392_v19, %v944_v28 }
 0x4b3   : >> { %s1189_s7 = sshll.u32 %s926_s30, 4  ;;  %vm936_vm7 = vcmp.eq.s32.totalorder %v1713_v37, %v923_v48  ;;  %vm937_vm12 = vcmp.eq.s32.totalorder %v1717_v10, %v923_v48  ;;  %v924_v49 = vsel %vm921_vm5, %v923_v48, %v1384_v46   ;;  %v925_v29 = vsel %vm922_vm6, %v923_v48, %v1380_v45   ;;  %s1801_s26 = smov %s977_s28 }
 0x4b4   : >> { %s932_s8 = sadd.s32 %s1189_s7, %s929_s6  ;;  %v938_v50 = vsel %vm936_vm7, 1, %v1421_v61  ;;  %v939_v35 = vsel %vm937_vm12, 1, %v1421_v61  ;;  %v1799_v45 = vmov %v925_v29  ;;  %v1800_v46 = vmov %v924_v49 }
 0x4b5   : >> { %v940_v52 = vrot.slane %v939_v35, 7  ;;  %s933_s9 = scalar_lea.vmem [#allocation2], %s932_s8 }
 0x4b6   : >> { %v934_v22 = vld [vmem:[%s933_s9] ss:$8 sm:$0x3] }
 0x4b7   : >> { %vm935_vm13 = vcmp.gt.f32.partialorder %v934_v22, 0.45  ;;  %v941_v36 = vsel %vm423_vm14, %v938_v50, %v940_v52 }
 0x4b8   : >> { %vm942_vm9 = vcmp.ne.s32.totalorder %v941_v36, 0 }
 0x4b9   : >> { %vm943_vm10 = vmor %vm935_vm13, %vm942_vm9 }
 0x4ba   : >> { %v946_v54 = vsel %vm943_vm10, 0, %v945_v53 }
 0x4bb   : >> { %v947_v19 = vperm.slane %v946_v54, 0   ;;  %v948_v15 = vperm.slane %v946_v54, 1  }
 0x4bd   : >> { %v949_v55 = vsel %vm423_vm14, %v947_v19, 2147483648  ;;  %v950_v56 = vsel %vm423_vm14, %v948_v15, 2147483648 }
 0x4be   : >> { %vm951_vm11 = vcmp.gt.s32.totalorder %v949_v55, %v950_v56 }
 0x4bf   : >> { %v952_v57 = vsel %vm951_vm11, %v949_v55, %v950_v56 }
 0x4c0   : >> { %v954_v58 = vshra.s32 %v952_v57, 16  ;;  %v953_v63 = vand.u32 65535, %v952_v57 }
 0x4c2   : >> { %v956_v62 = vcvt.s32.f32 %v954_v58  ;;  %v955_v25 = vcvt.s32.f32 %v953_v63 }
 0x4c4   : >> { %957 = vmax.xlane.f32.xlu0 %v956_v62 }
 0x537   : >> { %v958_v0 = vpop.xlane.xlu0 %957 }
 0x538   : >> { %vm959_vm15 = vcmp.eq.f32.partialorder %v956_v62, %v958_v0  ;;  %v964_v2 = vcvt.f32.s32 %v958_v0 }
 0x539   : >> { %v960_v1 = vsel %vm959_vm15, %v955_v25, -inf }
 0x53a   : >> { %961 = vmax.xlane.f32.xlu0 %v960_v1  ;;  %v965_v4 = vshll.u32 %v964_v2, 16 }
 0x5ad   : >> { %v962_v3 = vpop.xlane.xlu0 %961 }
 0x5ae   : >> { %v963_v5 = vcvt.f32.s32 %v962_v3 }
 0x5b0   : >> { %v966_v9 = vadd.s32 %v965_v4, %v963_v5 }
 0x5b2   : >> { %v967_v27 = vrot.slane %v966_v9, 4 }
 0x5b4   : >> { %vm968_vm0 = vcmp.gt.s32.totalorder %v966_v9, %v967_v27 }
 0x5b5   : >> { %v969_v59 = vsel %vm968_vm0, %v966_v9, %v967_v27 }
 0x5b6   : >> { %v970_v60 = vrot.slane %v969_v59, 2 }
 0x5b8   : >> { %vm971_vm1 = vcmp.gt.s32.totalorder %v969_v59, %v970_v60 }
 0x5b9   : >> { %v972_v11 = vsel %vm971_vm1, %v969_v59, %v970_v60 }
 0x5ba   : >> { %v973_v13 = vrot.slane %v972_v11, 1 }
 0x5bc   : >> { %vm974_vm2 = vcmp.gt.s32.totalorder %v972_v11, %v973_v13 }
 0x5bd   : >> { %v975_v6 = vsel %vm974_vm2, %v972_v11, %v973_v13 }
 0x5be   : >> { %1192 = vpush %v975_v6 }
 0x5ef   : >> { %s1193_s24 = spop %1192  }
 0x5f0   : >> { %p913_p7 = scmp.ge.s32.totalorder %s1193_s24, 256 }
 0x5f2   : >> { %p914_p8 = pnand %p913_p7, %p912_p6 }
 0x5f3   : > { %v1802_v32 = vmov (%p914_p8), %v925_v29  ;;  %v1803_v33 = vmov (%p914_p8), %v924_v49 }
 0x5f4   : > { %917 = sbr.rel (!%p914_p8) target bundleno = 1200 (0x4b0), region = 123 }
 0x5f9 PF: > { %v978_v7 = vrot.slane %v1404_v32, 7  ;;  %v1408_v33 = vphi %v1726_v33, %v1803_v33   ;;  %v1404_v32 = vphi %v1724_v32, %v1802_v32  }
 0x5fb   : > { %v979_v8 = vsel %vm423_vm14, %v1408_v33, %v978_v7 }
 0x5fc   : > { %980 = vst.msk [vmem:[%s255_s25] sm:$0x3] %vm1516_vm8, %v979_v8 }
 0x5fd PF: > { %s16_s18 = sadd.s32 1, %s1372_s18  }
 0x5fe   : > { %p13_p9 = scmp.ge.s32.totalorder %s16_s18, 4  }
 0x600   :  { %15 = sbr.rel (!%p13_p9) target bundleno = 1 (0x1), region = 134 }

</bundles_post_ra>
